<compile_context>
chip_gen: v5e
topology: v5e:2x2
jax: 0.10.0
libtpu: 0.0.40
codegen_flags: <defaults>
</compile_context>

<pallas_src>
import functools

import jax
import jax.numpy as jnp
from jax.experimental import pallas as pl
from jax.experimental.pallas import tpu as pltpu


# ------------------------------- Pallas kernel -------------------------------


def _fused_conv_bn_relu_kernel(mask_ref, x_ref, w_ref, g_ref, beta_ref, o_ref,
                               y_scr, sum_scr, sumsq_scr, scale_scr, shift_scr,
                               *, kh, kw, wp, ho, count, eps):
    """grid = (phase, batch); phase 0 = conv + stats, phase 1 = BN finalize + ReLU.

    mask_ref:  (1, L)            1.0 on valid columns (c % wp < wo), else 0.0
    x_ref:     (1, Cin, Lx)      zero-padded, spatially-flattened input (channel-major)
    w_ref:     (KH*KW, Cp8, Cin) per-tap weights, Cout zero-padded to a sublane multiple
    g_ref:     (Cp8, 1)          gamma (zero-padded)
    beta_ref:  (Cp8, 1)          beta  (zero-padded)
    o_ref:     (1, Cp8, L)       output block (channel-major, spatial on lanes)
    y_scr:     (N, Cp8, L)       VMEM-resident conv intermediate (never hits HBM)
    sum/sumsq/scale/shift_scr: (Cp8, 1) persistent BN scratch
    """
    phase = pl.program_id(0)
    bi = pl.program_id(1)
    cout_p = w_ref.shape[1]
    L = ho * wp

    @pl.when(phase == 0)
    def _conv_and_stats():
        @pl.when(bi == 0)
        def _init():
            sum_scr[...] = jnp.zeros_like(sum_scr)
            sumsq_scr[...] = jnp.zeros_like(sumsq_scr)

        x = x_ref[0]                                     # (Cin, Lx)
        acc = jnp.zeros((cout_p, L), jnp.float32)
        # Shift-and-matmul convolution: each tap is a static lane-sliced slab of x,
        # contracted over Cin on the MXU with f32 accumulation.
        for dh in range(kh):
            for dw in range(kw):
                t = dh * kw + dw
                off = dh * wp + dw
                acc = acc + jnp.dot(w_ref[t], x[:, off:off + L],
                                    preferred_element_type=jnp.float32)

        valid = acc * mask_ref[...]                      # zero the wrap-around columns
        sum_scr[...] += jnp.sum(valid, axis=1, keepdims=True)
        sumsq_scr[...] += jnp.sum(valid * valid, axis=1, keepdims=True)
        y_scr[bi] = acc                                  # stays in VMEM

    @pl.when(phase == 1)
    def _bn_relu():
        @pl.when(bi == 0)
        def _finalize_stats():
            inv_count = 1.0 / count
            mean = sum_scr[...] * inv_count              # (Cp8, 1)
            var = sumsq_scr[...] * inv_count - mean * mean   # biased var (BN training)
            inv_std = jax.lax.rsqrt(var + eps)
            scale_scr[...] = g_ref[...] * inv_std
            shift_scr[...] = beta_ref[...] - mean * g_ref[...] * inv_std

        z = y_scr[bi] * scale_scr[...] + shift_scr[...]  # lane-broadcast FMA
        o_ref[0] = jnp.maximum(z, 0.0).astype(o_ref.dtype)


# -------------------------------- Host wrapper --------------------------------


def conv2d_relu(x_nchw, weight_oihw, gamma, beta, *, padding=1, stride=1, eps=1e-5):
    """Forward of Conv2dReLU(in_c, out_c, k, padding, stride=1, use_batchnorm=True).

    x_nchw:      (N, Cin, H, W)   float32
    weight_oihw: (Cout, Cin, KH, KW)
    gamma, beta: (Cout,)
    returns:     (N, Cout, Ho, Wo) float32
    """
    assert stride == 1, "only stride=1 implemented"  # TODO(synk): stride > 1
    n, cin, h, w = x_nchw.shape
    cout, cin_w, kh, kw = weight_oihw.shape
    assert cin == cin_w

    hp, wp = h + 2 * padding, w + 2 * padding
    ho, wo = hp - kh + 1, wp - kw + 1
    L = ho * wp                       # flattened (row-major, incl. width padding)
    cout_p = ((cout + 7) // 8) * 8    # pad Cout to a sublane multiple only

    # ---- cheap XLA glue: spatial zero-pad + flatten (stays channel-major) ----
    x_pad = jnp.pad(x_nchw, ((0, 0), (0, 0), (padding, padding), (padding, padding)))
    x_flat = x_pad.reshape(n, cin, hp * wp)
    # tail slack so the last (dh,dw) tap's slab of length L stays in bounds
    x_flat = jnp.pad(x_flat, ((0, 0), (0, 0), (0, kw - 1)))
    lx = x_flat.shape[-1]

    # per-tap weights: (KH*KW, Cout_p8, Cin)
    w_taps = jnp.transpose(weight_oihw, (2, 3, 0, 1)).reshape(kh * kw, cout, cin)
    w_taps = jnp.pad(w_taps, ((0, 0), (0, cout_p - cout), (0, 0)))

    g_col = jnp.pad(gamma, (0, cout_p - cout)).reshape(cout_p, 1)
    b_col = jnp.pad(beta, (0, cout_p - cout)).reshape(cout_p, 1)

    # validity mask over the Ho*Wp flattened columns (c % wp < wo)
    mask = (jnp.arange(L) % wp < wo).astype(jnp.float32).reshape(1, L)

    count = float(n * ho * wo)

    cost = pl.CostEstimate(
        flops=2 * n * kh * kw * cout_p * cin * L + 6 * n * cout_p * L,
        transcendentals=cout_p,
        bytes_accessed=4 * (x_flat.size + w_taps.size + n * cout_p * L
                            + 4 * cout_p + L),
    )

    out = pl.pallas_call(
        functools.partial(_fused_conv_bn_relu_kernel,
                          kh=kh, kw=kw, wp=wp, ho=ho, count=count, eps=eps),
        out_shape=jax.ShapeDtypeStruct((n, cout_p, L), jnp.float32),
        grid=(2, n),                                   # (phase, batch)
        in_specs=[
            pl.BlockSpec((1, L), lambda p, b: (0, 0)),
            pl.BlockSpec((1, cin, lx), lambda p, b: ((1 - p) * b, 0, 0)),
            pl.BlockSpec((kh * kw, cout_p, cin), lambda p, b: (0, 0, 0)),
            pl.BlockSpec((cout_p, 1), lambda p, b: (0, 0)),
            pl.BlockSpec((cout_p, 1), lambda p, b: (0, 0)),
        ],
        # output blocks are only populated (and flushed) during phase 1
        out_specs=pl.BlockSpec((1, cout_p, L), lambda p, b: (p * b, 0, 0)),
        scratch_shapes=[
            pltpu.VMEM((n, cout_p, L), jnp.float32),   # conv intermediate (VMEM only)
            pltpu.VMEM((cout_p, 1), jnp.float32),      # sum
            pltpu.VMEM((cout_p, 1), jnp.float32),      # sum of squares
            pltpu.VMEM((cout_p, 1), jnp.float32),      # BN scale
            pltpu.VMEM((cout_p, 1), jnp.float32),      # BN shift
        ],
        compiler_params=pltpu.CompilerParams(
            dimension_semantics=("arbitrary", "arbitrary")),
        cost_estimate=cost,
    )(mask, x_flat, w_taps, g_col, b_col)

    # ---- cheap XLA glue: drop channel/width padding (reshape is free, slices cheap) ----
    out = out[:, :cout, :].reshape(n, cout, ho, wp)[:, :, :, :wo]
    return out


# ------------------------------ Pure-JAX reference ----------------------------


def _reference(x_nchw, weight_oihw, gamma, beta, *, padding=1, eps=1e-5):
    y = jax.lax.conv_general_dilated(
        x_nchw,
        weight_oihw,
        window_strides=(1, 1),
        padding=[(padding, padding), (padding, padding)],
        dimension_numbers=("NCHW", "OIHW", "NCHW"),
    )
    mean = jnp.mean(y, axis=(0, 2, 3), keepdims=True)
    var = jnp.mean((y - mean) ** 2, axis=(0, 2, 3), keepdims=True)
    z = (y - mean) * jax.lax.rsqrt(var + eps)
    z = z * gamma.reshape(1, -1, 1, 1) + beta.reshape(1, -1, 1, 1)
    return jnp.maximum(z, 0.0)


# ------------------------------------ Main ------------------------------------


if __name__ == "__main__":
    key = jax.random.PRNGKey(0)
    k_x, k_w, k_g, k_b = jax.random.split(key, 4)

    # Conv2dReLU(in_channels=4, out_channels=8, kernel_size=3, padding=1,
    #            stride=1, use_batchnorm=True)
    N, Cin, H, W = 2, 4, 16, 16
    Cout, KH, KW = 8, 3, 3

    x = jax.random.normal(k_x, (N, Cin, H, W), dtype=jnp.float32)
    weight = jax.random.normal(k_w, (Cout, Cin, KH, KW), dtype=jnp.float32) * 0.1
    gamma = 1.0 + 0.1 * jax.random.normal(k_g, (Cout,), dtype=jnp.float32)
    beta = 0.1 * jax.random.normal(k_b, (Cout,), dtype=jnp.float32)

    out = conv2d_relu(x, weight, gamma, beta, padding=1, stride=1)
    out = jax.block_until_ready(out)

    ref = _reference(x, weight, gamma, beta, padding=1)
    assert out.shape == (N, Cout, H, W), out.shape
    assert jnp.allclose(out, ref, atol=1e-3, rtol=1e-3), (
        float(jnp.max(jnp.abs(out - ref)))
    )
    print("KERNEL_OK")
</pallas_src>

<mosaic_0001>
module attributes {stable_mosaic.version = 11 : i64} {
  func.func @_fused_conv_bn_relu_kernel(%arg0: i32, %arg1: i32, %arg2: memref<1x288xf32, #tpu.memory_space<vmem>>, %arg3: memref<1x4x326xf32, #tpu.memory_space<vmem>>, %arg4: memref<9x8x4xf32, #tpu.memory_space<vmem>>, %arg5: memref<8x1xf32, #tpu.memory_space<vmem>>, %arg6: memref<8x1xf32, #tpu.memory_space<vmem>>, %arg7: memref<1x8x288xf32, #tpu.memory_space<vmem>>, %arg8: memref<2x8x288xf32, #tpu.memory_space<vmem>>, %arg9: memref<8x1xf32, #tpu.memory_space<vmem>>, %arg10: memref<8x1xf32, #tpu.memory_space<vmem>>, %arg11: memref<8x1xf32, #tpu.memory_space<vmem>>, %arg12: memref<8x1xf32, #tpu.memory_space<vmem>>) attributes {dimension_semantics = [#tpu.dimension_semantics<arbitrary>, #tpu.dimension_semantics<arbitrary>], iteration_bounds = array<i64: 2, 2>, scalar_prefetch = 0 : i64, scratch_operands = 5 : i64, tpu.core_type = #tpu.core_type<tc>, window_params = [{pipeline_mode = #tpu.pipeline_mode<synchronous>, transform_indices = @transform_0, window_bounds = array<i64: 1, 288>}, {transform_indices = @transform_1, window_bounds = array<i64: 1, 4, 326>}, {pipeline_mode = #tpu.pipeline_mode<synchronous>, transform_indices = @transform_2, window_bounds = array<i64: 9, 8, 4>}, {pipeline_mode = #tpu.pipeline_mode<synchronous>, transform_indices = @transform_3, window_bounds = array<i64: 8, 1>}, {pipeline_mode = #tpu.pipeline_mode<synchronous>, transform_indices = @transform_4, window_bounds = array<i64: 8, 1>}, {transform_indices = @transform_5, window_bounds = array<i64: 1, 8, 288>}]} {
    %c0_i32 = arith.constant 0 : i32
    %0 = arith.cmpi eq, %arg0, %c0_i32 : i32
    %1 = arith.extui %0 : i1 to i32
    %c0_i32_0 = arith.constant 0 : i32
    %2 = arith.cmpi ne, %1, %c0_i32_0 : i32
    scf.if %2 {
      %c0_i32_2 = arith.constant 0 : i32
      %6 = arith.cmpi eq, %arg1, %c0_i32_2 : i32
      %7 = arith.extui %6 : i1 to i32
      %c0_i32_3 = arith.constant 0 : i32
      %8 = arith.cmpi ne, %7, %c0_i32_3 : i32
      scf.if %8 {
        %cst_48 = arith.constant 0.000000e+00 : f32
        %75 = vector.broadcast %cst_48 : f32 to vector<8x1xf32>
        %c0_49 = arith.constant 0 : index
        %c0_50 = arith.constant 0 : index
        %76 = vector.load %arg9[%c0_49, %c0_50] : memref<8x1xf32, #tpu.memory_space<vmem>>, vector<8x1xf32>
        tpu.vector_store %arg9[%c0_49, %c0_50], %75 {strides = array<i32>} : memref<8x1xf32, #tpu.memory_space<vmem>>, vector<8x1xf32>,
        %cst_51 = arith.constant 0.000000e+00 : f32
        %77 = vector.broadcast %cst_51 : f32 to vector<8x1xf32>
        %c0_52 = arith.constant 0 : index
        %c0_53 = arith.constant 0 : index
        %78 = vector.load %arg10[%c0_52, %c0_53] : memref<8x1xf32, #tpu.memory_space<vmem>>, vector<8x1xf32>
        tpu.vector_store %arg10[%c0_52, %c0_53], %77 {strides = array<i32>} : memref<8x1xf32, #tpu.memory_space<vmem>>, vector<8x1xf32>,
      } else {
      }
      %c0 = arith.constant 0 : index
      %c0_4 = arith.constant 0 : index
      %c0_5 = arith.constant 0 : index
      %9 = vector.load %arg3[%c0, %c0_4, %c0_5] : memref<1x4x326xf32, #tpu.memory_space<vmem>>, vector<1x4x326xf32>
      %10 = vector.shape_cast %9 : vector<1x4x326xf32> to vector<4x326xf32>
      %cst = arith.constant 0.000000e+00 : f32
      %11 = vector.broadcast %cst : f32 to vector<8x288xf32>
      %c0_6 = arith.constant 0 : index
      %c0_7 = arith.constant 0 : index
      %c0_8 = arith.constant 0 : index
      %12 = vector.load %arg4[%c0_6, %c0_7, %c0_8] : memref<9x8x4xf32, #tpu.memory_space<vmem>>, vector<1x8x4xf32>
      %13 = vector.shape_cast %12 : vector<1x8x4xf32> to vector<8x4xf32>
      %14 = vector.extract_strided_slice %10 {offsets = [0, 0], sizes = [4, 288], strides = [1, 1]} : vector<4x326xf32> to vector<4x288xf32>
      %cst_9 = arith.constant dense<0.000000e+00> : vector<8x288xf32>
      %15 = tpu.matmul %13, %14, %cst_9 {dimension_numbers = #tpu.dot_dimension_numbers<[1], [0], [0], [1], [0, 0, 1, 1], [], []>} : vector<8x4xf32>, vector<4x288xf32>, vector<8x288xf32> -> vector<8x288xf32>
      %16 = arith.addf %11, %15 : vector<8x288xf32>
      %c1 = arith.constant 1 : index
      %c0_10 = arith.constant 0 : index
      %c0_11 = arith.constant 0 : index
      %17 = vector.load %arg4[%c1, %c0_10, %c0_11] : memref<9x8x4xf32, #tpu.memory_space<vmem>>, vector<1x8x4xf32>
      %18 = vector.shape_cast %17 : vector<1x8x4xf32> to vector<8x4xf32>
      %19 = vector.extract_strided_slice %10 {offsets = [0, 1], sizes = [4, 288], strides = [1, 1]} : vector<4x326xf32> to vector<4x288xf32>
      %cst_12 = arith.constant dense<0.000000e+00> : vector<8x288xf32>
      %20 = tpu.matmul %18, %19, %cst_12 {dimension_numbers = #tpu.dot_dimension_numbers<[1], [0], [0], [1], [0, 0, 1, 1], [], []>} : vector<8x4xf32>, vector<4x288xf32>, vector<8x288xf32> -> vector<8x288xf32>
      %21 = arith.addf %16, %20 : vector<8x288xf32>
      %c2 = arith.constant 2 : index
      %c0_13 = arith.constant 0 : index
      %c0_14 = arith.constant 0 : index
      %22 = vector.load %arg4[%c2, %c0_13, %c0_14] : memref<9x8x4xf32, #tpu.memory_space<vmem>>, vector<1x8x4xf32>
      %23 = vector.shape_cast %22 : vector<1x8x4xf32> to vector<8x4xf32>
      %24 = vector.extract_strided_slice %10 {offsets = [0, 2], sizes = [4, 288], strides = [1, 1]} : vector<4x326xf32> to vector<4x288xf32>
      %cst_15 = arith.constant dense<0.000000e+00> : vector<8x288xf32>
      %25 = tpu.matmul %23, %24, %cst_15 {dimension_numbers = #tpu.dot_dimension_numbers<[1], [0], [0], [1], [0, 0, 1, 1], [], []>} : vector<8x4xf32>, vector<4x288xf32>, vector<8x288xf32> -> vector<8x288xf32>
      %26 = arith.addf %21, %25 : vector<8x288xf32>
      %c3 = arith.constant 3 : index
      %c0_16 = arith.constant 0 : index
      %c0_17 = arith.constant 0 : index
      %27 = vector.load %arg4[%c3, %c0_16, %c0_17] : memref<9x8x4xf32, #tpu.memory_space<vmem>>, vector<1x8x4xf32>
      %28 = vector.shape_cast %27 : vector<1x8x4xf32> to vector<8x4xf32>
      %29 = vector.extract_strided_slice %10 {offsets = [0, 18], sizes = [4, 288], strides = [1, 1]} : vector<4x326xf32> to vector<4x288xf32>
      %cst_18 = arith.constant dense<0.000000e+00> : vector<8x288xf32>
      %30 = tpu.matmul %28, %29, %cst_18 {dimension_numbers = #tpu.dot_dimension_numbers<[1], [0], [0], [1], [0, 0, 1, 1], [], []>} : vector<8x4xf32>, vector<4x288xf32>, vector<8x288xf32> -> vector<8x288xf32>
      %31 = arith.addf %26, %30 : vector<8x288xf32>
      %c4 = arith.constant 4 : index
      %c0_19 = arith.constant 0 : index
      %c0_20 = arith.constant 0 : index
      %32 = vector.load %arg4[%c4, %c0_19, %c0_20] : memref<9x8x4xf32, #tpu.memory_space<vmem>>, vector<1x8x4xf32>
      %33 = vector.shape_cast %32 : vector<1x8x4xf32> to vector<8x4xf32>
      %34 = vector.extract_strided_slice %10 {offsets = [0, 19], sizes = [4, 288], strides = [1, 1]} : vector<4x326xf32> to vector<4x288xf32>
      %cst_21 = arith.constant dense<0.000000e+00> : vector<8x288xf32>
      %35 = tpu.matmul %33, %34, %cst_21 {dimension_numbers = #tpu.dot_dimension_numbers<[1], [0], [0], [1], [0, 0, 1, 1], [], []>} : vector<8x4xf32>, vector<4x288xf32>, vector<8x288xf32> -> vector<8x288xf32>
      %36 = arith.addf %31, %35 : vector<8x288xf32>
      %c5 = arith.constant 5 : index
      %c0_22 = arith.constant 0 : index
      %c0_23 = arith.constant 0 : index
      %37 = vector.load %arg4[%c5, %c0_22, %c0_23] : memref<9x8x4xf32, #tpu.memory_space<vmem>>, vector<1x8x4xf32>
      %38 = vector.shape_cast %37 : vector<1x8x4xf32> to vector<8x4xf32>
      %39 = vector.extract_strided_slice %10 {offsets = [0, 20], sizes = [4, 288], strides = [1, 1]} : vector<4x326xf32> to vector<4x288xf32>
      %cst_24 = arith.constant dense<0.000000e+00> : vector<8x288xf32>
      %40 = tpu.matmul %38, %39, %cst_24 {dimension_numbers = #tpu.dot_dimension_numbers<[1], [0], [0], [1], [0, 0, 1, 1], [], []>} : vector<8x4xf32>, vector<4x288xf32>, vector<8x288xf32> -> vector<8x288xf32>
      %41 = arith.addf %36, %40 : vector<8x288xf32>
      %c6 = arith.constant 6 : index
      %c0_25 = arith.constant 0 : index
      %c0_26 = arith.constant 0 : index
      %42 = vector.load %arg4[%c6, %c0_25, %c0_26] : memref<9x8x4xf32, #tpu.memory_space<vmem>>, vector<1x8x4xf32>
      %43 = vector.shape_cast %42 : vector<1x8x4xf32> to vector<8x4xf32>
      %44 = vector.extract_strided_slice %10 {offsets = [0, 36], sizes = [4, 288], strides = [1, 1]} : vector<4x326xf32> to vector<4x288xf32>
      %cst_27 = arith.constant dense<0.000000e+00> : vector<8x288xf32>
      %45 = tpu.matmul %43, %44, %cst_27 {dimension_numbers = #tpu.dot_dimension_numbers<[1], [0], [0], [1], [0, 0, 1, 1], [], []>} : vector<8x4xf32>, vector<4x288xf32>, vector<8x288xf32> -> vector<8x288xf32>
      %46 = arith.addf %41, %45 : vector<8x288xf32>
      %c7 = arith.constant 7 : index
      %c0_28 = arith.constant 0 : index
      %c0_29 = arith.constant 0 : index
      %47 = vector.load %arg4[%c7, %c0_28, %c0_29] : memref<9x8x4xf32, #tpu.memory_space<vmem>>, vector<1x8x4xf32>
      %48 = vector.shape_cast %47 : vector<1x8x4xf32> to vector<8x4xf32>
      %49 = vector.extract_strided_slice %10 {offsets = [0, 37], sizes = [4, 288], strides = [1, 1]} : vector<4x326xf32> to vector<4x288xf32>
      %cst_30 = arith.constant dense<0.000000e+00> : vector<8x288xf32>
      %50 = tpu.matmul %48, %49, %cst_30 {dimension_numbers = #tpu.dot_dimension_numbers<[1], [0], [0], [1], [0, 0, 1, 1], [], []>} : vector<8x4xf32>, vector<4x288xf32>, vector<8x288xf32> -> vector<8x288xf32>
      %51 = arith.addf %46, %50 : vector<8x288xf32>
      %c8 = arith.constant 8 : index
      %c0_31 = arith.constant 0 : index
      %c0_32 = arith.constant 0 : index
      %52 = vector.load %arg4[%c8, %c0_31, %c0_32] : memref<9x8x4xf32, #tpu.memory_space<vmem>>, vector<1x8x4xf32>
      %53 = vector.shape_cast %52 : vector<1x8x4xf32> to vector<8x4xf32>
      %54 = vector.extract_strided_slice %10 {offsets = [0, 38], sizes = [4, 288], strides = [1, 1]} : vector<4x326xf32> to vector<4x288xf32>
      %cst_33 = arith.constant dense<0.000000e+00> : vector<8x288xf32>
      %55 = tpu.matmul %53, %54, %cst_33 {dimension_numbers = #tpu.dot_dimension_numbers<[1], [0], [0], [1], [0, 0, 1, 1], [], []>} : vector<8x4xf32>, vector<4x288xf32>, vector<8x288xf32> -> vector<8x288xf32>
      %56 = arith.addf %51, %55 : vector<8x288xf32>
      %c0_34 = arith.constant 0 : index
      %c0_35 = arith.constant 0 : index
      %57 = vector.load %arg2[%c0_34, %c0_35] : memref<1x288xf32, #tpu.memory_space<vmem>>, vector<1x288xf32>
      %58 = vector.broadcast %57 : vector<1x288xf32> to vector<8x288xf32>
      %59 = arith.mulf %56, %58 : vector<8x288xf32>
      %c0_36 = arith.constant 0 : index
      %c0_37 = arith.constant 0 : index
      %60 = vector.load %arg9[%c0_36, %c0_37] : memref<8x1xf32, #tpu.memory_space<vmem>>, vector<8x1xf32>
      %cst_38 = arith.constant dense<0.000000e+00> : vector<8xf32>
      %61 = vector.multi_reduction <add>, %59, %cst_38 [1] : vector<8x288xf32> to vector<8xf32>
      %62 = vector.shape_cast %61 : vector<8xf32> to vector<8x1xf32>
      %63 = arith.addf %60, %62 : vector<8x1xf32>
      %c0_39 = arith.constant 0 : index
      %c0_40 = arith.constant 0 : index
      %64 = vector.load %arg9[%c0_39, %c0_40] : memref<8x1xf32, #tpu.memory_space<vmem>>, vector<8x1xf32>
      tpu.vector_store %arg9[%c0_39, %c0_40], %63 {strides = array<i32>} : memref<8x1xf32, #tpu.memory_space<vmem>>, vector<8x1xf32>,
      %c0_41 = arith.constant 0 : index
      %c0_42 = arith.constant 0 : index
      %65 = vector.load %arg10[%c0_41, %c0_42] : memref<8x1xf32, #tpu.memory_space<vmem>>, vector<8x1xf32>
      %66 = arith.mulf %59, %59 : vector<8x288xf32>
      %cst_43 = arith.constant dense<0.000000e+00> : vector<8xf32>
      %67 = vector.multi_reduction <add>, %66, %cst_43 [1] : vector<8x288xf32> to vector<8xf32>
      %68 = vector.shape_cast %67 : vector<8xf32> to vector<8x1xf32>
      %69 = arith.addf %65, %68 : vector<8x1xf32>
      %c0_44 = arith.constant 0 : index
      %c0_45 = arith.constant 0 : index
      %70 = vector.load %arg10[%c0_44, %c0_45] : memref<8x1xf32, #tpu.memory_space<vmem>>, vector<8x1xf32>
      tpu.vector_store %arg10[%c0_44, %c0_45], %69 {strides = array<i32>} : memref<8x1xf32, #tpu.memory_space<vmem>>, vector<8x1xf32>,
      %71 = arith.index_cast %arg1 : i32 to index
      %c0_46 = arith.constant 0 : index
      %c0_47 = arith.constant 0 : index
      %72 = vector.load %arg8[%71, %c0_46, %c0_47] : memref<2x8x288xf32, #tpu.memory_space<vmem>>, vector<1x8x288xf32>
      %73 = vector.shape_cast %72 : vector<1x8x288xf32> to vector<8x288xf32>
      %74 = vector.shape_cast %56 : vector<8x288xf32> to vector<1x8x288xf32>
      tpu.vector_store %arg8[%71, %c0_46, %c0_47], %74 {strides = array<i32>} : memref<2x8x288xf32, #tpu.memory_space<vmem>>, vector<1x8x288xf32>,
    } else {
    }
    %c1_i32 = arith.constant 1 : i32
    %3 = arith.cmpi eq, %arg0, %c1_i32 : i32
    %4 = arith.extui %3 : i1 to i32
    %c0_i32_1 = arith.constant 0 : i32
    %5 = arith.cmpi ne, %4, %c0_i32_1 : i32
    scf.if %5 {
      %c0_i32_2 = arith.constant 0 : i32
      %6 = arith.cmpi eq, %arg1, %c0_i32_2 : i32
      %7 = arith.extui %6 : i1 to i32
      %c0_i32_3 = arith.constant 0 : i32
      %8 = arith.cmpi ne, %7, %c0_i32_3 : i32
      scf.if %8 {
        %c0_12 = arith.constant 0 : index
        %c0_13 = arith.constant 0 : index
        %23 = vector.load %arg9[%c0_12, %c0_13] : memref<8x1xf32, #tpu.memory_space<vmem>>, vector<8x1xf32>
        %cst_14 = arith.constant 0.001953125 : f32
        %24 = vector.broadcast %cst_14 : f32 to vector<8x1xf32>
        %25 = arith.mulf %23, %24 : vector<8x1xf32>
        %c0_15 = arith.constant 0 : index
        %c0_16 = arith.constant 0 : index
        %26 = vector.load %arg10[%c0_15, %c0_16] : memref<8x1xf32, #tpu.memory_space<vmem>>, vector<8x1xf32>
        %cst_17 = arith.constant 0.001953125 : f32
        %27 = vector.broadcast %cst_17 : f32 to vector<8x1xf32>
        %28 = arith.mulf %26, %27 : vector<8x1xf32>
        %29 = arith.mulf %25, %25 : vector<8x1xf32>
        %30 = arith.subf %28, %29 : vector<8x1xf32>
        %cst_18 = arith.constant 9.99999974E-6 : f32
        %31 = vector.broadcast %cst_18 : f32 to vector<8x1xf32>
        %32 = arith.addf %30, %31 : vector<8x1xf32>
        %33 = math.rsqrt %32 : vector<8x1xf32>
        %c0_19 = arith.constant 0 : index
        %c0_20 = arith.constant 0 : index
        %34 = vector.load %arg5[%c0_19, %c0_20] : memref<8x1xf32, #tpu.memory_space<vmem>>, vector<8x1xf32>
        %35 = arith.mulf %34, %33 : vector<8x1xf32>
        %c0_21 = arith.constant 0 : index
        %c0_22 = arith.constant 0 : index
        %36 = vector.load %arg11[%c0_21, %c0_22] : memref<8x1xf32, #tpu.memory_space<vmem>>, vector<8x1xf32>
        tpu.vector_store %arg11[%c0_21, %c0_22], %35 {strides = array<i32>} : memref<8x1xf32, #tpu.memory_space<vmem>>, vector<8x1xf32>,
        %c0_23 = arith.constant 0 : index
        %c0_24 = arith.constant 0 : index
        %37 = vector.load %arg6[%c0_23, %c0_24] : memref<8x1xf32, #tpu.memory_space<vmem>>, vector<8x1xf32>
        %c0_25 = arith.constant 0 : index
        %c0_26 = arith.constant 0 : index
        %38 = vector.load %arg5[%c0_25, %c0_26] : memref<8x1xf32, #tpu.memory_space<vmem>>, vector<8x1xf32>
        %39 = arith.mulf %25, %38 : vector<8x1xf32>
        %40 = arith.mulf %39, %33 : vector<8x1xf32>
        %41 = arith.subf %37, %40 : vector<8x1xf32>
        %c0_27 = arith.constant 0 : index
        %c0_28 = arith.constant 0 : index
        %42 = vector.load %arg12[%c0_27, %c0_28] : memref<8x1xf32, #tpu.memory_space<vmem>>, vector<8x1xf32>
        tpu.vector_store %arg12[%c0_27, %c0_28], %41 {strides = array<i32>} : memref<8x1xf32, #tpu.memory_space<vmem>>, vector<8x1xf32>,
      } else {
      }
      %9 = arith.index_cast %arg1 : i32 to index
      %c0 = arith.constant 0 : index
      %c0_4 = arith.constant 0 : index
      %10 = vector.load %arg8[%9, %c0, %c0_4] : memref<2x8x288xf32, #tpu.memory_space<vmem>>, vector<1x8x288xf32>
      %11 = vector.shape_cast %10 : vector<1x8x288xf32> to vector<8x288xf32>
      %c0_5 = arith.constant 0 : index
      %c0_6 = arith.constant 0 : index
      %12 = vector.load %arg11[%c0_5, %c0_6] : memref<8x1xf32, #tpu.memory_space<vmem>>, vector<8x1xf32>
      %13 = vector.broadcast %12 : vector<8x1xf32> to vector<8x288xf32>
      %14 = arith.mulf %11, %13 : vector<8x288xf32>
      %c0_7 = arith.constant 0 : index
      %c0_8 = arith.constant 0 : index
      %15 = vector.load %arg12[%c0_7, %c0_8] : memref<8x1xf32, #tpu.memory_space<vmem>>, vector<8x1xf32>
      %16 = vector.broadcast %15 : vector<8x1xf32> to vector<8x288xf32>
      %17 = arith.addf %14, %16 : vector<8x288xf32>
      %cst = arith.constant 0.000000e+00 : f32
      %18 = vector.broadcast %cst : f32 to vector<8x288xf32>
      %19 = arith.maximumf %17, %18 : vector<8x288xf32>
      %c0_9 = arith.constant 0 : index
      %c0_10 = arith.constant 0 : index
      %c0_11 = arith.constant 0 : index
      %20 = vector.load %arg7[%c0_9, %c0_10, %c0_11] : memref<1x8x288xf32, #tpu.memory_space<vmem>>, vector<1x8x288xf32>
      %21 = vector.shape_cast %20 : vector<1x8x288xf32> to vector<8x288xf32>
      %22 = vector.shape_cast %19 : vector<8x288xf32> to vector<1x8x288xf32>
      tpu.vector_store %arg7[%c0_9, %c0_10, %c0_11], %22 {strides = array<i32>} : memref<1x8x288xf32, #tpu.memory_space<vmem>>, vector<1x8x288xf32>,
    } else {
    }
    return
  }
  func.func @transform_0(%arg0: i32, %arg1: i32) -> (i32, i32) {
    %c0_i32 = arith.constant 0 : i32
    %c0_i32_0 = arith.constant 0 : i32
    %c0_i32_1 = arith.constant 0 : i32
    return %c0_i32, %c0_i32_0 : i32, i32
  }
  func.func @transform_1(%arg0: i32, %arg1: i32) -> (i32, i32, i32) {
    %c1_i32 = arith.constant 1 : i32
    %0 = arith.subi %c1_i32, %arg0 : i32
    %1 = arith.muli %0, %arg1 : i32
    %c0_i32 = arith.constant 0 : i32
    %c0_i32_0 = arith.constant 0 : i32
    %c0_i32_1 = arith.constant 0 : i32
    return %1, %c0_i32, %c0_i32_0 : i32, i32, i32
  }
  func.func @transform_2(%arg0: i32, %arg1: i32) -> (i32, i32, i32) {
    %c0_i32 = arith.constant 0 : i32
    %c0_i32_0 = arith.constant 0 : i32
    %c0_i32_1 = arith.constant 0 : i32
    %c0_i32_2 = arith.constant 0 : i32
    return %c0_i32, %c0_i32_0, %c0_i32_1 : i32, i32, i32
  }
  func.func @transform_3(%arg0: i32, %arg1: i32) -> (i32, i32) {
    %c0_i32 = arith.constant 0 : i32
    %c0_i32_0 = arith.constant 0 : i32
    %c0_i32_1 = arith.constant 0 : i32
    return %c0_i32, %c0_i32_0 : i32, i32
  }
  func.func @transform_4(%arg0: i32, %arg1: i32) -> (i32, i32) {
    %c0_i32 = arith.constant 0 : i32
    %c0_i32_0 = arith.constant 0 : i32
    %c0_i32_1 = arith.constant 0 : i32
    return %c0_i32, %c0_i32_0 : i32, i32
  }
  func.func @transform_5(%arg0: i32, %arg1: i32) -> (i32, i32, i32) {
    %0 = arith.muli %arg0, %arg1 : i32
    %c0_i32 = arith.constant 0 : i32
    %c0_i32_0 = arith.constant 0 : i32
    %c0_i32_1 = arith.constant 0 : i32
    return %0, %c0_i32, %c0_i32_0 : i32, i32, i32
  }
}

</mosaic_0001>

<bundles_post_ra>
// kernel: tpu_custom_call.1
= control target key start
LH: loop header
LB: loop body
LE: loop exit
PB: predicated region body
PF: predicated region fallthrough
CT: control target
= control target key end

     0   :  { %s1802_s0 = inlined_call_operand.vmem [shape: f32[1,288], index: 0, kind: input, shape index: {}]   ;;  %s1803_s1 = inlined_call_operand.vmem [shape: f32[2,4,326], index: 1, kind: input, shape index: {}]   ;;  %s1804_s2 = inlined_call_operand.vmem [shape: f32[9,8,4], index: 2, kind: input, shape index: {}]   ;;  %s1805_s3 = inlined_call_operand.vmem [shape: f32[8,1], index: 3, kind: input, shape index: {}]   ;;  %s1806_s4 = inlined_call_operand.vmem [shape: f32[8,1], index: 4, kind: input, shape index: {}]   ;;  %s1807_s5 = inlined_call_operand.hbm [shape: f32[2,8,288], index: 5, kind: output, shape index: {}]  }
   0x1   :  { %1808 = sst [smem:[#allocation10_spill]] %s1802_s0 }
   0x2   :  { %10 = vsyncpa [#allocation8], 0 }
   0x3   :  { %12 = vsyncpa [#allocation8 + $0x1], 0  ;;  %s1552_s18 = smov 0   ;;  %s1554_s19 = smov 0  }
   0x4   :  { %s1556_s20 = smov 0   ;;  %s1558_s21 = smov 0  }
   0x5   :  { %s1560_s22 = smov 0   ;;  %s1562_s23 = smov 0  }
   0x6   :  { %s1564_s24 = smov 0   ;;  %s1566_s25 = smov 0  }
   0x7 LB: > { %s1250_s26 = sadd.s32 4294967295, %s1510_s25   ;;  %s1251_s27 = sadd.s32 4294967294, %s1510_s25   ;;  %s1510_s25 = sphi %s1566_s25, %s18_s25   ;;  %s1506_s24 = sphi %s1564_s24, %s1818_s24   ;;  %s1502_s23 = sphi %s1562_s23, %s1817_s23   ;;  %s1498_s22 = sphi %s1560_s22, %s1816_s22   ;;  %s1494_s21 = sphi %s1558_s21, %s1815_s21   ;;  %s1490_s20 = sphi %s1556_s20, %s1814_s20   ;;  %s1486_s19 = sphi %s1554_s19, %s1813_s19   ;;  %s1482_s18 = sphi %s1552_s18, %s1812_s18  }
   0x8   : > { %s27_s28 = sadd.s32 1, %s1502_s23  ;;  %s30_s29 = sadd.s32 1, %s1506_s24 }
   0x9   : > { %p28_p0 = scmp.ge.s32.totalorder %s27_s28, 2  ;;  %s148_s30 = smul.u32 %s1502_s23, %s1506_s24 }
   0xa   : > { %p163_p1 = scmp.ne.s32.totalorder %s1490_s20, %s1486_s19  ;;  %p164_p2 = scmp.eq.s32.totalorder %s1250_s26, 3 }
   0xb   : > { %s1820_s28 = smov (%p28_p0, %s27_s28), 0  ;;  %s1822_s29 = smov (!%p28_p0, %s30_s29), %s1506_s24 }
   0xc   : > { %p169_p3 = scmp.ne.s32.totalorder %s1486_s19, %s1482_s18  ;;  %p32_p4 = scmp.ge.s32.totalorder %s1822_s29, 2 }
   0xd   : > { %p170_p5 = scmp.eq.s32.totalorder %s1251_s27, 3  ;;  %p1605_p6 = por %p164_p2, %p163_p1 }
   0xe   : > { %p1254_p7 = scmp.ge.s32.totalorder %s1510_s25, 1  ;;  %s1824_s29 = smov (%p32_p4, %s1822_s29), 0 }
   0xf   : > { %p1612_p8 = por %p170_p5, %p169_p3  ;;  %p212_p9 = scmp.lt.s32.totalorder %s1510_s25, 5 }
  0x10   : > { %s149_s8 = smul.u32 %s1824_s29, %s1820_s28  ;;  %s153_s10 = sadd.s32 1, %s1490_s20 }
  0x11   : > { %p213_p10 = pnand %p1254_p7, %p212_p9 }
  0x12   : > { %s150_s9 = ssub.s32 %s148_s30, %s149_s8  ;;  %s239_s12 = sand.u32 (!%p213_p10), 1, %s1486_s19  }
  0x13   : > { %p151_p11 = scmp.eq.s32.totalorder %s150_s9, 0  ;;  %216 = sbr.rel (%p213_p10) target bundleno = 688 (0x2b0), region = 40 }
  0x14   : > { %s242_s13 = ssub.s32 (!%p213_p10), 1, %s1498_s22  ;;  %s1329_s14 = smul.u32 (!%p213_p10), 24, %s239_s12 }
  0x15   : > { %s1621_s11 = scalar_select %p151_p11, %s1490_s20, %s153_s10  }
  0x16   : > { %s243_s15 = smul.u32 (!%p213_p10), %s1494_s21, %s242_s13  ;;  %s1631_s30 = scalar_lea.vmem (!%p213_p10), [#allocation7], %s1329_s14 }
  0x17   : > { %p1256_p13 = scmp.ne.s32.totalorder (!%p213_p10), %s1498_s22, 0 }
  0x18   : > { %p244_p12 = scmp.lt.s32.totalorder %s243_s15, 1  ;;  %p1257_p0 = scmp.ne.s32.totalorder (!%p1256_p13), %s1494_s21, 0 }
  0x19   : > { %255 = sbr.rel (%p1256_p13) target bundleno = 491 (0x1eb), region = 44 }
  0x1a   : > { %s1826_s15 = smov (!%p244_p12, %s243_s15), 1 }
  0x1b   : > { %s1330_s16 = smul.u32 12, %s1826_s15 }
  0x1d   : > { %s248_s27 = scalar_lea.vmem %s1803_s1, %s1330_s16 }
  0x1e   : > { %259 = sbr.rel (%p1257_p0) target bundleno = 38 (0x26), region = 48 }
  0x23   : > { %vm260_vm0 = vcmask 7168   ;;  %v1512_v0 = vmov 0.0  }
  0x24   : > { %261 = vst.msk [vmem:[#allocation3] sm:$0xff] %vm260_vm0, %v1512_v0 }
  0x25   : > { %262 = vst.msk [vmem:[#allocation4] sm:$0xff] %vm260_vm0, %v1512_v0 }
  0x26 PF: > { %v264_v1 = vld [vmem:[%s248_s27 + $0x8] sm:$0xf]  ;;  %v1635_v2 = vld [vmem:[%s248_s27] sm:$0xff]  ;;  %s1513_s8 = smov 127   ;;  %s1514_s9 = smov 126   ;;  %vm289_vm1 = vcmask 1043456  }
  0x27   : > { %272 = vst [vmem:[#allocation1 + $0x10] ss:$2 sm:$0xff] %v264_v1  ;;  %s1515_s10 = smov 110   ;;  %s1516_s13 = smov 109   ;;  %vm285_vm2 = vcmask 31744   ;;  %v265_v30 = vld [vmem:[%s1804_s2] sm:$0xff] }
  0x28   : > { %270 = vst [vmem:[#allocation1] ss:$2 sm:$0xff] %v1635_v2  ;;  %s1517_s14 = smov 108   ;;  %s1518_s15 = smov 92   ;;  %vm282_vm3 = vcmask 1039360   ;;  %v1258_v32 = vld [vmem:[%s1804_s2 + $0x8] sm:$0xff] }
  0x29   : > { %s1519_s16 = smov 91   ;;  %s1520_s17 = smov 90   ;;  %vm445_vm4 = vcmask 1031168   ;;  %v1271_v37 = vld [vmem:[%s1804_s2 + $0x10] sm:$0xff]  ;;  %vm534_vm5 = vcmask 900096   ;;  %v1278_v47 = vld [vmem:[%s1804_s2 + $0x18] sm:$0xff] }
  0x2a   : > { %vm623_vm6 = vcmask 891904   ;;  %v1285_v53 = vld [vmem:[%s1804_s2 + $0x20] sm:$0xff]  ;;  %vm712_vm7 = vcmask 883712   ;;  %v1292_v58 = vld [vmem:[%s1804_s2 + $0x28] sm:$0xff]  ;;  %vm801_vm8 = vcmask 752640   ;;  %vm890_vm9 = vcmask 744448  }
  0x2b   : > { %vm979_vm10 = vcmask 736256   ;;  %s1811_s0 = sld [smem:[#allocation10_spill]]  ;;  %vm1067_vm11 = vcmask 261120   ;;  %vm1073_vm12 = vcmask 7168  }
  0x2e   : > { %v275_v3 = vld.sshfl [vmem:[#allocation1 + $0x10] sm:$0xff pattern:$0x75316420] }
  0x2f   : > { %280 = vrot.lane.b32.xlu0 %v275_v3, %s1513_s8  ;;  %358 = vst [vmem:[#allocation1 + $0x10] ss:$2 sm:$0xff] %v264_v1  ;;  %v274_v4 = vld.sshfl [vmem:[#allocation1 + $0x8] sm:$0xff pattern:$0x75316420] }
  0x30   : > { %278 = vrot.lane.b32.xlu1 %v274_v4, %s1513_s8  ;;  %v273_v5 = vld.sshfl [vmem:[#allocation1] sm:$0xff pattern:$0x75316420] }
  0x31   : > { %356 = vst [vmem:[#allocation1] ss:$2 sm:$0xff] %v1635_v2 }
  0x36   : > { %v1639_v6 = vld.sshfl [vmem:[#allocation1 + $0x10] sm:$0xff pattern:$0x75316420] }
  0x37   : > { %276 = vrot.lane.b32.xlu0 %v273_v5, %s1513_s8  ;;  %435 = vst [vmem:[#allocation1 + $0x10] ss:$2 sm:$0xff] %v264_v1 }
  0x38   : > { %v1641_v7 = vld.sshfl [vmem:[#allocation1] sm:$0xff pattern:$0x75316420]  ;;  %v1643_v8 = vld.sshfl [vmem:[#allocation1 + $0x8] sm:$0xff pattern:$0x75316420] }
  0x39   : > { %433 = vst [vmem:[#allocation1] ss:$2 sm:$0xff] %v1635_v2  ;;  %1265 = vmatpush.msk.msra.mxu3 %vm289_vm1, %v1641_v7 }
  0x3a   : > { %1266 = vmatmul.msk.f32.vlgmr.msra.gmra.mxu3 %vm285_vm2, %v265_v30 }
  0x3e   : > { %v438_v9 = vld.sshfl [vmem:[#allocation1 + $0x10] sm:$0xff pattern:$0x75316420] }
  0x3f   : > { %524 = vst [vmem:[#allocation1 + $0x10] ss:$2 sm:$0xff] %v264_v1 }
  0x40   : > { %v436_v10 = vld.sshfl [vmem:[#allocation1] sm:$0xff pattern:$0x75316420]  ;;  %v437_v11 = vld.sshfl [vmem:[#allocation1 + $0x8] sm:$0xff pattern:$0x75316420] }
  0x41   : > { %439 = vrot.lane.b32.xlu1 %v436_v10, %s1514_s9  ;;  %522 = vst [vmem:[#allocation1] ss:$2 sm:$0xff] %v1635_v2  ;;  %441 = vrot.lane.b32.xlu2 %v437_v11, %s1514_s9 }
  0x46   : > { %v527_v12 = vld.sshfl [vmem:[#allocation1 + $0x10] sm:$0xff pattern:$0x75316420] }
  0x47   : > { %613 = vst [vmem:[#allocation1 + $0x10] ss:$2 sm:$0xff] %v264_v1 }
  0x48   : > { %v526_v13 = vld.sshfl [vmem:[#allocation1 + $0x8] sm:$0xff pattern:$0x75316420]  ;;  %v525_v14 = vld.sshfl [vmem:[#allocation1] sm:$0xff pattern:$0x75316420] }
  0x49   : > { %532 = vrot.lane.b32.xlu1 %v527_v12, %s1515_s10  ;;  %530 = vrot.lane.b32.xlu0 %v526_v13, %s1515_s10  ;;  %611 = vst [vmem:[#allocation1] ss:$2 sm:$0xff] %v1635_v2  ;;  %v1313_v12 = vld [vmem:[%s1804_s2 + $0x40] sm:$0xff] }
  0x4a   : > { %443 = vrot.lane.b32.xlu2 %v438_v9, %s1514_s9 }
  0x4e   : > { %v616_v15 = vld.sshfl [vmem:[#allocation1 + $0x10] sm:$0xff pattern:$0x75316420] }
  0x4f   : > { %702 = vst [vmem:[#allocation1 + $0x10] ss:$2 sm:$0xff] %v264_v1 }
  0x50   : > { %v615_v16 = vld.sshfl [vmem:[#allocation1 + $0x8] sm:$0xff pattern:$0x75316420]  ;;  %v614_v17 = vld.sshfl [vmem:[#allocation1] sm:$0xff pattern:$0x75316420] }
  0x51   : > { %621 = vrot.lane.b32.xlu0 %v616_v15, %s1516_s13  ;;  %617 = vrot.lane.b32.xlu1 %v614_v17, %s1516_s13  ;;  %700 = vst [vmem:[#allocation1] ss:$2 sm:$0xff] %v1635_v2 }
  0x52   : > { %528 = vrot.lane.b32.xlu2 %v525_v14, %s1515_s10 }
  0x56   : > { %v705_v18 = vld.sshfl [vmem:[#allocation1 + $0x10] sm:$0xff pattern:$0x75316420] }
  0x57   : > { %791 = vst [vmem:[#allocation1 + $0x10] ss:$2 sm:$0xff] %v264_v1 }
  0x58   : > { %v704_v19 = vld.sshfl [vmem:[#allocation1 + $0x8] sm:$0xff pattern:$0x75316420]  ;;  %v703_v20 = vld.sshfl [vmem:[#allocation1] sm:$0xff pattern:$0x75316420] }
  0x59   : > { %708 = vrot.lane.b32.xlu1 %v704_v19, %s1517_s14  ;;  %706 = vrot.lane.b32.xlu0 %v703_v20, %s1517_s14  ;;  %789 = vst [vmem:[#allocation1] ss:$2 sm:$0xff] %v1635_v2 }
  0x5a   : > { %619 = vrot.lane.b32.xlu2 %v615_v16, %s1516_s13 }
  0x5e   : > { %v794_v21 = vld.sshfl [vmem:[#allocation1 + $0x10] sm:$0xff pattern:$0x75316420] }
  0x5f   : > { %880 = vst [vmem:[#allocation1 + $0x10] ss:$2 sm:$0xff] %v264_v1 }
  0x60   : > { %v793_v22 = vld.sshfl [vmem:[#allocation1 + $0x8] sm:$0xff pattern:$0x75316420]  ;;  %v792_v23 = vld.sshfl [vmem:[#allocation1] sm:$0xff pattern:$0x75316420] }
  0x61   : > { %710 = vrot.lane.b32.xlu1 %v705_v18, %s1517_s14  ;;  %797 = vrot.lane.b32.xlu0 %v793_v22, %s1518_s15  ;;  %878 = vst [vmem:[#allocation1] ss:$2 sm:$0xff] %v1635_v2 }
  0x62   : > { %795 = vrot.lane.b32.xlu2 %v792_v23, %s1518_s15 }
  0x66   : > { %v883_v24 = vld.sshfl [vmem:[#allocation1 + $0x10] sm:$0xff pattern:$0x75316420] }
  0x67   : > { %969 = vst [vmem:[#allocation1 + $0x10] ss:$2 sm:$0xff] %v264_v1 }
  0x68   : > { %v882_v25 = vld.sshfl [vmem:[#allocation1 + $0x8] sm:$0xff pattern:$0x75316420]  ;;  %v881_v26 = vld.sshfl [vmem:[#allocation1] sm:$0xff pattern:$0x75316420] }
  0x69   : > { %888 = vrot.lane.b32.xlu1 %v883_v24, %s1519_s16  ;;  %886 = vrot.lane.b32.xlu0 %v882_v25, %s1519_s16  ;;  %967 = vst [vmem:[#allocation1] ss:$2 sm:$0xff] %v1635_v2  ;;  %v1299_v2 = vld [vmem:[%s1804_s2 + $0x30] sm:$0xff] }
  0x6a   : > { %799 = vrot.lane.b32.xlu2 %v794_v21, %s1518_s15 }
  0x6e   : > { %v972_v27 = vld.sshfl [vmem:[#allocation1 + $0x10] sm:$0xff pattern:$0x75316420] }
  0x70   : > { %v970_v28 = vld.sshfl [vmem:[#allocation1] sm:$0xff pattern:$0x75316420]  ;;  %v971_v29 = vld.sshfl [vmem:[#allocation1 + $0x8] sm:$0xff pattern:$0x75316420] }
  0x71   : > { %977 = vrot.lane.b32.xlu0 %v972_v27, %s1520_s17  ;;  %973 = vrot.lane.b32.xlu1 %v970_v28, %s1520_s17 }
  0x72   : > { %884 = vrot.lane.b32.xlu2 %v881_v26, %s1519_s16  ;;  %s1327_s16 = smul.u32 24, %s1494_s21 }
  0x74   : > { %s1088_s27 = scalar_lea.vmem [#allocation2], %s1327_s16 }
  0x7a   : > { %975 = vrot.lane.b32.xlu2 %v971_v29, %s1520_s17 }
  0x9b   : > { %v442_v31 = vpop.permute.xlu2 %441 }
  0xa1   : > { %v281_v33 = vpop.permute.xlu0 %280 }
  0xa2   : > { %v279_v34 = vpop.permute.xlu1 %278  ;;  %1263 = vmatpush.msk.msra.mxu2 %vm289_vm1, %v281_v33 }
  0xa3   : > { %v284_v35 = vsel %vm282_vm3, %v279_v34, %v281_v33  ;;  %1264 = vmatmul.msk.f32.vlgmr.msra.gmra.mxu2 %vm285_vm2, %v1258_v32 }
  0xa4   : > { %1261 = vmatpush.msk.msra.mxu1 %vm289_vm1, %v284_v35  ;;  %v444_v36 = vpop.permute.xlu2 %443 }
  0xa5   : > { %1262 = vmatmul.msk.f32.vlgmr.msra.gmra.mxu1 %vm285_vm2, %v1258_v32  ;;  %v447_v38 = vsel %vm445_vm4, %v442_v31, %v444_v36 }
  0xa6   : > { %1274 = vmatpush.msk.msrb.mxu3 %vm289_vm1, %v447_v38  ;;  %1269 = vmatpush.msk.msrb.mxu1 %vm289_vm1, %v1639_v6  ;;  %v1306_v6 = vld [vmem:[%s1804_s2 + $0x38] sm:$0xff] }
  0xa7   : > { %1275 = vmatmul.msk.f32.vlgmr.msrb.gmra.mxu3 %vm285_vm2, %v1271_v37 }
  0xa9   : > { %v277_v39 = vpop.permute.xlu0 %276 }
  0xaa   : > { %v283_v40 = vsel %vm282_vm3, %v277_v39, %v279_v34 }
  0xab   : > { %1259 = vmatpush.msk.msra.mxu0 %vm289_vm1, %v283_v40 }
  0xac   : > { %1260 = vmatmul.msk.f32.vlgmr.msra.gmra.mxu0 %vm285_vm2, %v1258_v32  ;;  %v529_v41 = vpop.permute.xlu2 %528 }
  0xad   : > { %1267 = vmatpush.msk.msrb.mxu0 %vm289_vm1, %v1643_v8  ;;  %1270 = vmatmul.msk.f32.vlgmr.msrb.gmra.mxu1 %vm285_vm2, %v265_v30 }
  0xaf   : > { %1276 = vmatpush.msk.msra.mxu0 %vm289_vm1, %v444_v36 }
  0xb3   : > { %v440_v42 = vpop.permute.xlu1 %439 }
  0xb4   : > { %v446_v43 = vsel %vm445_vm4, %v440_v42, %v442_v31  ;;  %1268 = vmatmul.msk.f32.vlgmr.msrb.gmra.mxu0 %vm285_vm2, %v265_v30  ;;  %v620_v44 = vpop.permute.xlu2 %619 }
  0xb5   : > { %1272 = vmatpush.msk.msrb.mxu2 %vm289_vm1, %v446_v43 }
  0xb6   : > { %1273 = vmatmul.msk.f32.vlgmr.msrb.gmra.mxu2 %vm285_vm2, %v1271_v37 }
  0xbb   : > { %v533_v45 = vpop.permute.xlu1 %532  ;;  %v531_v46 = vpop.permute.xlu0 %530 }
  0xbc   : > { %v536_v48 = vsel %vm534_vm5, %v531_v46, %v533_v45  ;;  %v535_v49 = vsel %vm534_vm5, %v529_v41, %v531_v46  ;;  %1283 = vmatpush.msk.msra.mxu3 %vm289_vm1, %v533_v45  ;;  %1277 = vmatmul.msk.f32.vlgmr.msra.gmra.mxu0 %vm285_vm2, %v1271_v37  ;;  %v796_v50 = vpop.permute.xlu2 %795 }
  0xbd   : > { %1279 = vmatpush.msk.msra.mxu1 %vm289_vm1, %v535_v49  ;;  %1281 = vmatpush.msk.msra.mxu2 %vm289_vm1, %v536_v48  ;;  %v388_v18 = vpop.f32.mrf.mxu3 }
  0xbe   : > { %1282 = vmatmul.msk.f32.vlgmr.msra.gmra.mxu2 %vm285_vm2, %v1278_v47  ;;  %1280 = vmatmul.msk.f32.vlgmr.msra.gmra.mxu1 %vm285_vm2, %v1278_v47 }
  0xbf   : > { %1284 = vmatmul.msk.f32.vlgmr.msra.gmra.mxu3 %vm285_vm2, %v1278_v47 }
  0xc3   : > { %v622_v51 = vpop.permute.xlu0 %621  ;;  %v618_v52 = vpop.permute.xlu1 %617 }
  0xc4   : > { %v625_v54 = vsel %vm623_vm6, %v620_v44, %v622_v51  ;;  %v624_v55 = vsel %vm623_vm6, %v618_v52, %v620_v44  ;;  %1290 = vmatpush.msk.msrb.mxu2 %vm289_vm1, %v622_v51  ;;  %v800_v60 = vpop.permute.xlu2 %799  ;;  %v1054_v52 = vld [vmem:[%s1811_s0] sm:$0x7] }
  0xc5   : > { %1286 = vmatpush.msk.msrb.mxu0 %vm289_vm1, %v624_v55  ;;  %1288 = vmatpush.msk.msrb.mxu1 %vm289_vm1, %v625_v54 }
  0xc6   : > { %1291 = vmatmul.msk.f32.vlgmr.msrb.gmra.mxu2 %vm285_vm2, %v1285_v53  ;;  %1287 = vmatmul.msk.f32.vlgmr.msrb.gmra.mxu0 %vm285_vm2, %v1285_v53 }
  0xc7   : > { %1289 = vmatmul.msk.f32.vlgmr.msrb.gmra.mxu1 %vm285_vm2, %v1285_v53 }
  0xcb   : > { %v709_v56 = vpop.permute.xlu1 %708  ;;  %v707_v57 = vpop.permute.xlu0 %706 }
  0xcc   : > { %v713_v59 = vsel %vm712_vm7, %v707_v57, %v709_v56  ;;  %v885_v3 = vpop.permute.xlu2 %884 }
  0xcd   : > { %1293 = vmatpush.msk.msrb.mxu3 %vm289_vm1, %v713_v59  ;;  %v1056_v59 = vperm.slane %v1054_v52, 0 }
  0xce   : > { %1294 = vmatmul.msk.f32.vlgmr.msrb.gmra.mxu3 %vm285_vm2, %v1292_v58 }
  0xd3   : > { %v711_v61 = vpop.permute.xlu1 %710  ;;  %v798_v62 = vpop.permute.xlu0 %797 }
  0xd4   : > { %v714_v63 = vsel %vm712_vm7, %v709_v56, %v711_v61  ;;  %v802_v0 = vsel %vm801_vm8, %v796_v50, %v798_v62  ;;  %v803_v1 = vsel %vm801_vm8, %v798_v62, %v800_v60  ;;  %1297 = vmatpush.msk.msra.mxu1 %vm289_vm1, %v711_v61  ;;  %v976_v9 = vpop.permute.xlu2 %975 }
  0xd5   : > { %1295 = vmatpush.msk.msra.mxu0 %vm289_vm1, %v714_v63  ;;  %1298 = vmatmul.msk.f32.vlgmr.msra.gmra.mxu1 %vm285_vm2, %v1292_v58 }
  0xd6   : > { %1300 = vmatpush.msk.msra.mxu2 %vm289_vm1, %v802_v0  ;;  %1302 = vmatpush.msk.msra.mxu3 %vm289_vm1, %v803_v1 }
  0xd7   : > { %1296 = vmatmul.msk.f32.vlgmr.msra.gmra.mxu0 %vm285_vm2, %v1292_v58  ;;  %1301 = vmatmul.msk.f32.vlgmr.msra.gmra.mxu2 %vm285_vm2, %v1299_v2 }
  0xd8   : > { %1303 = vmatmul.msk.f32.vlgmr.msra.gmra.mxu3 %vm285_vm2, %v1299_v2  ;;  %1304 = vmatpush.msk.msrb.mxu0 %vm289_vm1, %v800_v60  ;;  %v1057_v60 = vperm.slane %v1054_v52, 1 }
  0xdb   : > { %v889_v4 = vpop.permute.xlu1 %888  ;;  %v887_v5 = vpop.permute.xlu0 %886 }
  0xdc   : > { %v892_v7 = vsel %vm890_vm9, %v887_v5, %v889_v4  ;;  %v891_v8 = vsel %vm890_vm9, %v885_v3, %v887_v5  ;;  %1311 = vmatpush.msk.msrb.mxu3 %vm289_vm1, %v889_v4  ;;  %v1058_v5 = vperm.slane %v1054_v52, 2 }
  0xdd   : > { %1307 = vmatpush.msk.msrb.mxu1 %vm289_vm1, %v891_v8  ;;  %1309 = vmatpush.msk.msrb.mxu2 %vm289_vm1, %v892_v7 }
  0xde   : > { %1308 = vmatmul.msk.f32.vlgmr.msrb.gmra.mxu1 %vm285_vm2, %v1306_v6 }
  0xdf   : > { %1305 = vmatmul.msk.f32.vlgmr.msrb.gmra.mxu0 %vm285_vm2, %v1299_v2  ;;  %1310 = vmatmul.msk.f32.vlgmr.msrb.gmra.mxu2 %vm285_vm2, %v1306_v6 }
  0xe0   : > { %1312 = vmatmul.msk.f32.vlgmr.msrb.gmra.mxu3 %vm285_vm2, %v1306_v6 }
  0xe3   : > { %v978_v10 = vpop.permute.xlu0 %977  ;;  %v974_v11 = vpop.permute.xlu1 %973 }
  0xe4   : > { %v981_v13 = vsel %vm979_vm10, %v976_v9, %v978_v10  ;;  %v980_v14 = vsel %vm979_vm10, %v974_v11, %v976_v9  ;;  %1318 = vmatpush.msk.msra.mxu2 %vm289_vm1, %v978_v10 }
  0xe5   : > { %1314 = vmatpush.msk.msra.mxu0 %vm289_vm1, %v980_v14  ;;  %1316 = vmatpush.msk.msra.mxu1 %vm289_vm1, %v981_v13 }
  0xe6   : > { %1317 = vmatmul.msk.f32.vlgmr.msra.gmra.mxu1 %vm285_vm2, %v1313_v12 }
  0xe7   : > { %1315 = vmatmul.msk.f32.vlgmr.msra.gmra.mxu0 %vm285_vm2, %v1313_v12  ;;  %1319 = vmatmul.msk.f32.vlgmr.msra.gmra.mxu2 %vm285_vm2, %v1313_v12 }
 0x122   : > { %v333_v15 = vpop.f32.mrf.mxu1 }
 0x126   : > { %v353_v17 = vpop.f32.mrf.mxu2 }
 0x129   : > { %v313_v16 = vpop.f32.mrf.mxu0 }
 0x12a   : > { %v428_v19 = vpop.f32.mrf.mxu1  ;;  %v494_v22 = vpop.f32.mrf.mxu3  ;;  %v389_v29 = vadd.f32 %v388_v18, %v313_v16  ;;  %v1065_v18 = vld [vmem:[#allocation3] sm:$0xff] }
 0x12b   : > { %v429_v40 = vadd.f32 %v428_v19, %v353_v17 }
 0x131   : > { %v408_v20 = vpop.f32.mrf.mxu0 }
 0x132   : > { %v409_v33 = vadd.f32 %v408_v20, %v333_v15  ;;  %v1075_v20 = vld [vmem:[#allocation4] sm:$0xff] }
 0x134   : > { %v518_v36 = vadd.f32 %v494_v22, %v409_v33 }
 0x139   : > { %v474_v21 = vpop.f32.mrf.mxu2  ;;  %v514_v24 = vpop.f32.mrf.mxu0 }
 0x13a   : > { %v517_v35 = vadd.f32 %v474_v21, %v389_v29  ;;  %v519_v47 = vadd.f32 %v514_v24, %v429_v40 }
 0x13b   : > { %v563_v23 = vpop.f32.mrf.mxu1 }
 0x13c   : > { %v606_v37 = vadd.f32 %v563_v23, %v517_v35 }
 0x141   : > { %v583_v25 = vpop.f32.mrf.mxu2 }
 0x142   : > { %v603_v26 = vpop.f32.mrf.mxu3  ;;  %v607_v38 = vadd.f32 %v583_v25, %v518_v36 }
 0x143   : > { %v652_v28 = vpop.f32.mrf.mxu0  ;;  %v608_v50 = vadd.f32 %v603_v26, %v519_v47 }
 0x144   : > { %v672_v27 = vpop.f32.mrf.mxu1  ;;  %v695_v41 = vadd.f32 %v652_v28, %v606_v37 }
 0x145   : > { %v696_v45 = vadd.f32 %v672_v27, %v607_v38 }
 0x149   : > { %v692_v30 = vpop.f32.mrf.mxu2 }
 0x14a   : > { %v697_v54 = vadd.f32 %v692_v30, %v608_v50 }
 0x151   : > { %v741_v31 = vpop.f32.mrf.mxu3 }
 0x152   : > { %v781_v32 = vpop.f32.mrf.mxu1  ;;  %v784_v46 = vadd.f32 %v741_v31, %v695_v41 }
 0x153   : > { %v786_v61 = vadd.f32 %v781_v32, %v697_v54 }
 0x154   : > { %v761_v34 = vpop.f32.mrf.mxu0 }
 0x155   : > { %v785_v48 = vadd.f32 %v761_v34, %v696_v45 }
 0x15a   : > { %v830_v39 = vpop.f32.mrf.mxu2 }
 0x15b   : > { %v919_v42 = vpop.f32.mrf.mxu1  ;;  %v850_v43 = vpop.f32.mrf.mxu3  ;;  %v873_v49 = vadd.f32 %v830_v39, %v784_v46 }
 0x15c   : > { %v870_v44 = vpop.f32.mrf.mxu0  ;;  %v874_v51 = vadd.f32 %v850_v43, %v785_v48 }
 0x15d   : > { %v962_v55 = vadd.f32 %v919_v42, %v873_v49  ;;  %v875_v1 = vadd.f32 %v870_v44, %v786_v61 }
 0x162   : > { %v939_v53 = vpop.f32.mrf.mxu2 }
 0x163   : > { %v963_v56 = vadd.f32 %v939_v53, %v874_v51  ;;  %v1028_v57 = vpop.f32.mrf.mxu1  ;;  %v959_v0 = vpop.f32.mrf.mxu3 }
 0x164   : > { %v1008_v58 = vpop.f32.mrf.mxu0  ;;  %v964_v4 = vadd.f32 %v959_v0, %v875_v1 }
 0x165   : > { %v1051_v62 = vadd.f32 %v1008_v58, %v962_v55  ;;  %v1052_v63 = vadd.f32 %v1028_v57, %v963_v56 }
 0x167   : > { %1089 = vst [vmem:[%s1088_s27] sm:$0xff] %v1051_v62  ;;  %v1062_v2 = vmul.f32 %v1056_v59, %v1051_v62  ;;  %v1063_v3 = vmul.f32 %v1057_v60, %v1052_v63 }
 0x168   : > { %1090 = vst [vmem:[%s1088_s27 + $0x8] sm:$0xff] %v1052_v63 }
 0x169   : > { %v1076_v8 = vmul.f32 %v1062_v2, %v1062_v2  ;;  %v1077_v9 = vmul.f32 %v1063_v3, %v1063_v3  ;;  %v1066_v11 = vadd.f32 %v1063_v3, %v1062_v2 }
 0x16a   : > { %v1048_v6 = vpop.f32.mrf.mxu2 }
 0x16b   : > { %v1053_v7 = vadd.f32 %v1048_v6, %v964_v4  ;;  %v1079_v15 = vadd.f32 %v1077_v9, %v1076_v8 }
 0x16d   : > { %v1064_v10 = vmul.f32 %v1058_v5, %v1053_v7  ;;  %1091 = vst.msk [vmem:[%s1088_s27 + $0x10] sm:$0xff] %vm1067_vm11, %v1053_v7 }
 0x16f   : > { %v1068_v12 = vsel %vm1067_vm11, %v1064_v10, 0.0  ;;  %v1078_v13 = vmul.f32 %v1064_v10, %v1064_v10 }
 0x170   : > { %v1069_v14 = vadd.f32 %v1068_v12, %v1066_v11 }
 0x171   : > { %v1080_v16 = vsel %vm1067_vm11, %v1078_v13, 0.0 }
 0x172   : > { %1070 = vadd.xlane.f32.xlu0 %v1069_v14  ;;  %v1081_v17 = vadd.f32 %v1080_v16, %v1079_v15 }
 0x174   : > { %1082 = vadd.xlane.f32.xlu1 %v1081_v17 }
 0x1e5   : > { %v1071_v19 = vpop.xlane.xlu0 %1070 }
 0x1e6   : > { %v1072_v21 = vadd.f32 %v1071_v19, %v1065_v18 }
 0x1e7   : > { %v1083_v22 = vpop.xlane.xlu1 %1082 }
 0x1e8   : > { %1074 = vst.msk [vmem:[#allocation3] sm:$0xff] %vm1073_vm12, %v1072_v21  ;;  %v1084_v23 = vadd.f32 %v1083_v22, %v1075_v20 }
 0x1ea   : > { %1085 = vst.msk [vmem:[#allocation4] sm:$0xff] %vm1073_vm12, %v1084_v23 }
 0x1eb PF: > { %p1321_p1 = scmp.ne.s32.totalorder %s1498_s22, 1 }
 0x1ec   : > { %p1322_p2 = scmp.ne.s32.totalorder (!%p1321_p1), %s1494_s21, 0 }
 0x1ed   : > { %1095 = sbr.rel (%p1321_p1) target bundleno = 670 (0x29e), region = 52 }
 0x1f2   : > { %1099 = sbr.rel (%p1322_p2) target bundleno = 535 (0x217), region = 56 }
 0x1f7   : > { %v1100_v24 = vld [vmem:[#allocation3] sm:$0xff]  ;;  %v1102_v25 = vld [vmem:[#allocation4] sm:$0xff]  ;;  %vm1119_vm0 = vcmask 7168  }
 0x1f8   : > { %v1101_v26 = vmul.f32 0.001953125, %v1100_v24  ;;  %v1103_v27 = vmul.f32 0.001953125, %v1102_v25  ;;  %v1117_v35 = vld [vmem:[%s1805_s3] sm:$0xff] }
 0x1f9   : > { %v1121_v40 = vld [vmem:[%s1806_s4] sm:$0xff] }
 0x1fa   : > { %v1104_v28 = vmul.f32 %v1101_v26, %v1101_v26  ;;  %v1123_v37 = vmul.f32 %v1117_v35, %v1101_v26 }
 0x1fc   : > { %v1105_v29 = vsub.f32 %v1103_v27, %v1104_v28 }
 0x1fe   : > { %v1106_v30 = vadd.f32 1e-05, %v1105_v29 }
 0x200   : > { %1413 = vrsqrt.f32 %v1106_v30  ;;  %vm1113_vm13 = vweird.f32 %v1106_v30 }
 0x206   : > { %v1414_v31 = vpop.eup %1413 }
 0x207   : > { %v1108_v32 = vmul.f32 %v1414_v31, %v1106_v30  ;;  %vm1114_vm14 = vweird.f32 %v1414_v31 }
 0x208   : > { %vm1115_vm15 = vmor %vm1113_vm13, %vm1114_vm14 }
 0x209   : > { %v1109_v33 = vmul.f32 %v1414_v31, %v1108_v32 }
 0x20b   : > { %v1110_v34 = vmul.f32 0.5, %v1109_v33 }
 0x20d   : > { %v1111_v36 = vsub.f32 1.5, %v1110_v34 }
 0x20f   : > { %v1112_v38 = vmul.f32 %v1414_v31, %v1111_v36 }
 0x211   : > { %v1116_v39 = vsel %vm1115_vm15, %v1414_v31, %v1112_v38 }
 0x212   : > { %v1118_v41 = vmul.f32 %v1117_v35, %v1116_v39  ;;  %v1124_v42 = vmul.f32 %v1123_v37, %v1116_v39 }
 0x214   : > { %1120 = vst.msk [vmem:[#allocation5] sm:$0xff] %vm1119_vm0, %v1118_v41  ;;  %v1125_v43 = vsub.f32 %v1121_v40, %v1124_v42 }
 0x216   : > { %1126 = vst.msk [vmem:[#allocation6] sm:$0xff] %vm1119_vm0, %v1125_v43 }
 0x217 PF: > { %v1521_v45 = vmov 0   ;;  %s1328_s14 = smul.u32 24, %s1494_s21  ;;  %vm1156_vm1 = vcmask 261120  }
 0x218   : > { %1415 = vset.pattern.permute.xlu0 %v1521_v45 }
 0x219   : > { %s1129_s15 = scalar_lea.vmem [#allocation2], %s1328_s14 }
 0x21a   : > { %v1130_v48 = vld [vmem:[%s1129_s15] sm:$0xff]  ;;  %v1131_v49 = vld [vmem:[%s1129_s15 + $0x8] sm:$0xff]  ;;  %v1132_v50 = vld [vmem:[%s1129_s15 + $0x10] sm:$0xff] }
 0x21b   : > { %v1133_v44 = vld [vmem:[#allocation5] sm:$0xff] }
 0x21c   : > { %1136 = vperm.xlu0 %1415, %v1133_v44  }
 0x21d   : > { %v1142_v46 = vld [vmem:[#allocation6] sm:$0xff] }
 0x224   : > { %1145 = vperm.xlu0 %1415, %v1142_v46  }
 0x28e   : > { %v1137_v47 = vpop.permute.xlu0 %1136 }
 0x28f   : > { %v1139_v51 = vmul.f32 %v1137_v47, %v1130_v48  ;;  %v1140_v52 = vmul.f32 %v1137_v47, %v1131_v49  ;;  %v1141_v53 = vmul.f32 %v1137_v47, %v1132_v50 }
 0x296   : > { %v1146_v54 = vpop.permute.xlu0 %1145 }
 0x297   : > { %v1148_v55 = vadd.f32 %v1146_v54, %v1139_v51  ;;  %v1149_v56 = vadd.f32 %v1146_v54, %v1140_v52  ;;  %v1150_v57 = vadd.f32 %v1146_v54, %v1141_v53 }
 0x299   : > { %v1151_v58 = vmax.f32 %v1148_v55, 0.0  ;;  %v1152_v59 = vmax.f32 %v1149_v56, 0.0  ;;  %v1153_v60 = vmax.f32 %v1150_v57, 0.0 }
 0x29b   : > { %1154 = vst [vmem:[%s1631_s30] sm:$0xff] %v1151_v58 }
 0x29c   : > { %1155 = vst [vmem:[%s1631_s30 + $0x8] sm:$0xff] %v1152_v59 }
 0x29d   : > { %1157 = vst.msk [vmem:[%s1631_s30 + $0x10] sm:$0xff] %vm1156_vm1, %v1153_v60 }
 0x29e PF: > { %s1166_s16 = smul.u32 %s1494_s21, %s1498_s22  ;;  %s1173_s17 = sshll.u32 %s1631_s30, 4  ;;  %s1174_s17 = int_to_ptr.vmem [resolvable:$true] %s1173_s17 }
 0x29f   : > { %s1159_s13 = scalar_lea.sflag [#allocation8], %s239_s12  ;;  %s1436_s22 = scalar_lea.hbm %s1807_s5, 48 }
 0x2a0   : > { %s1331_s26 = smul.u32 24, %s1166_s16 }
 0x2a2   : > { %s1171_s9 = scalar_lea.hbm %s1807_s5, %s1331_s26 }
 0x2a3   : > { %s1175_s10 = sshll.u32 %s1171_s9, 4  ;;  %s1176_s10 = int_to_ptr.hbm [resolvable:$true] %s1175_s10 }
 0x2a4   : > { %s1430_s14 = sshra.s32 %s1176_s10, 4  ;;  %s1431_s14 = int_to_ptr.hbm [resolvable:$true] %s1430_s14 }
 0x2a5   : > { %s1432_s15 = scalar_lea.hbm %s1431_s14, 24  ;;  %p1437_p7 = scmp.lt.s32.totalorder %s1431_s14, %s1807_s5 }
 0x2a6   : > { %p1433_p3 = scmp.ne.s32.totalorder %s1431_s14, %s1432_s15  ;;  %p1438_p9 = scmp.lt.s32.totalorder %s1436_s22, %s1432_s15 }
 0x2a8   : > { %p1434_p4 = pnand %p1433_p3, %p1605_p6  ;;  %p1439_p10 = por %p1438_p9, %p1437_p7 }
 0x2aa   : > { %p1435_p5 = pneg %p1434_p4 }
 0x2ac   : > { %p1440_p11 = pnand %p1439_p10, %p1435_p5 }
 0x2ae   : > { %1443 = shalt.err (!%p1440_p11)
}
 0x2af   : > { %1332 = dma.vmem_to_hbm [thread:$0]  (%p1605_p6), %s1174_s17, 384, %s1176_s10, %s1159_s13  }
 0x2b0 PF: > { %p1338_p12 = scmp.ge.s32.totalorder %s1510_s25, 2  ;;  %s1187_s12 = sand.u32 1, %s1482_s18  }
 0x2b1   : > { %s1188_s0 = scalar_lea.sflag [#allocation8], %s1187_s12 }
 0x2b2   : > { %p1335_p13 = pnand %p1338_p12, %p1612_p8 }
 0x2b4   : > { %p1336_p0 = pneg %p1335_p13 }
 0x2b6   : > { %1477 = dma.done.wait (%p1336_p0), %s1188_s0, 384  }
 0x2b7   : > { %1479 = vsyncadd (%p1336_p0), %s1188_s0, 4294966912  ;;  %s18_s25 = sadd.s32 1, %s1510_s25   ;;  %s1812_s18 = smov %s1486_s19 }
 0x2b8   : > { %p15_p1 = scmp.ge.s32.totalorder %s18_s25, 6   ;;  %s1813_s19 = smov %s1490_s20 }
 0x2b9   : > { %s1814_s20 = smov %s1621_s11  ;;  %s1815_s21 = smov %s1502_s23 }
 0x2ba   : > { %s1816_s22 = smov %s1506_s24  ;;  %s1817_s23 = smov %s1820_s28 }
 0x2bb   : > { %s1818_s24 = smov %s1824_s29  ;;  %17 = sbr.rel (!%p15_p1) target bundleno = 7 (0x7), region = 110 }
 0x2c0   :  { %1194 = vsyncpa [#allocation8], 1 }
 0x2c1   :  { %1196 = vsyncpa [#allocation8 + $0x1], 1 }

</bundles_post_ra>
